<compile_context>
chip_gen: v7x
topology: tpu7x:2x2x1
jax: 0.10.0
libtpu: 0.0.40
codegen_flags: <defaults>
</compile_context>

<pallas_src>
import jax
import jax.numpy as jnp
from jax.experimental import pallas as pl
from jax.experimental.pallas import tpu as pltpu

EPS = 1e-5


def _fused_bn_relu_shrink_kernel(x_ref, ss_ref, w_ref, b_ref, o_ref):
    # x_ref : (TM, C_in)  native dtype      ss_ref: (2, C_in) f32 (scale, shift)
    # w_ref : (C_in, C_out) f32             b_ref : (1, C_out) f32
    # o_ref : (TM, C_out) f32
    x = x_ref[...].astype(jnp.float32)
    scale = ss_ref[0:1, :]                        # (1, C_in)
    shift = ss_ref[1:2, :]                        # (1, C_in)
    h = jnp.maximum(x * scale + shift, 0.0)       # BN(eval) + ReLU, f32 on VPU
    # Dropout is identity in eval mode.
    y = jnp.dot(h, w_ref[...], preferred_element_type=jnp.float32)  # 1x1 conv
    o_ref[...] = y + b_ref[...]                   # narrow (TM, C_out) store


def _pick_tm(M, cap):
    """Largest multiple of 8 that divides M and is <= cap (None if M % 8)."""
    if M % 8 != 0:
        return None
    hi = min(cap, M)
    hi -= hi % 8
    for tm in range(hi, 0, -8):
        if M % tm == 0:
            return tm
    return None


def prepare_params(params):
    """Hoist grid-invariant parameter math out of the per-call forward path."""
    scale = params["gamma"] * jax.lax.rsqrt(params["var"] + EPS)   # (C_in,)
    shift = params["beta"] - params["mean"] * scale                # (C_in,)
    return {
        "ss": jnp.stack([scale, shift], axis=0),                   # (2, C_in)
        "w": params["w"].astype(jnp.float32),                      # (C_in, C_out)
        "b": params["b"].reshape(1, -1).astype(jnp.float32),       # (1, C_out)
    }


def temporal_model_base_forward(x, prepared, num_joints_in, in_features,
                                num_joints_out, tm_cap=4096):
    """x: (B, T, J_in, F_in) -> (B, T, J_out, 3) float32 (eval-mode forward)."""
    assert x.ndim == 4
    assert x.shape[-2] == num_joints_in
    assert x.shape[-1] == in_features
    B, T = x.shape[0], x.shape[1]
    C_in = num_joints_in * in_features
    C_out = num_joints_out * 3

    # PyTorch: view(B, T, -1) then permute(0, 2, 1). Since every op here is
    # pointwise over (batch, time) plus a 1x1 conv over channels, flattening
    # B*T into one M axis is mathematically identical and pipeline friendly.
    M = B * T
    x_mc = x.reshape(M, C_in)                     # free metadata reshape

    TM = _pick_tm(M, tm_cap)
    if TM is None:
        # Rare fallback: M not a multiple of 8 -> pad rows, slice afterwards.
        TM = min(tm_cap, ((M + 7) // 8) * 8)
        M_pad = pl.cdiv(M, TM) * TM
        x_mc = jnp.pad(x_mc, ((0, M_pad - M), (0, 0)))
    else:
        M_pad = M

    out = pl.pallas_call(
        _fused_bn_relu_shrink_kernel,
        out_shape=jax.ShapeDtypeStruct((M_pad, C_out), jnp.float32),
        grid=(M_pad // TM,),
        in_specs=[
            pl.BlockSpec((TM, C_in), lambda i: (i, 0)),      # x tile
            pl.BlockSpec((2, C_in), lambda i: (0, 0)),       # BN scale/shift
            pl.BlockSpec((C_in, C_out), lambda i: (0, 0)),   # shrink weight
            pl.BlockSpec((1, C_out), lambda i: (0, 0)),      # shrink bias
        ],
        out_specs=pl.BlockSpec((TM, C_out), lambda i: (i, 0)),
        compiler_params=pltpu.CompilerParams(
            dimension_semantics=("parallel",)),
    )(x_mc, prepared["ss"], prepared["w"], prepared["b"])

    if M_pad != M:
        out = out[:M]
    # PyTorch: permute back then view(B, -1, J_out, 3).
    return out.reshape(B, T, num_joints_out, 3)


def make_params(key, num_joints_in, in_features, num_joints_out):
    C_in = num_joints_in * in_features
    C_out = num_joints_out * 3
    k1, k2, k3, k4, k5 = jax.random.split(key, 5)
    return {
        # BatchNorm1d(channels) parameters / running stats (eval mode)
        "gamma": jax.random.uniform(k1, (C_in,), jnp.float32, 0.5, 1.5),
        "beta":  jax.random.normal(k2, (C_in,), jnp.float32) * 0.1,
        "mean":  jax.random.normal(k3, (C_in,), jnp.float32) * 0.1,
        "var":   jax.random.uniform(k4, (C_in,), jnp.float32, 0.5, 1.5),
        # Conv1d(channels, num_joints_out*3, 1): torch weight (C_out, C_in, 1);
        # stored transposed as (C_in, C_out) for channels-last matmul.
        "w": jax.random.normal(k5, (C_in, C_out), jnp.float32) * 0.05,
        "b": jnp.linspace(-0.1, 0.1, C_out, dtype=jnp.float32),
    }


def _reference(x, params, num_joints_in, in_features, num_joints_out):
    B, T = x.shape[0], x.shape[1]
    C_in = num_joints_in * in_features
    xb = x.reshape(B, T, C_in).astype(jnp.float32)
    scale = params["gamma"] * jax.lax.rsqrt(params["var"] + EPS)
    shift = params["beta"] - params["mean"] * scale
    h = jnp.maximum(xb * scale + shift, 0.0)
    y = jnp.einsum("btc,cd->btd", h, params["w"]) + params["b"]
    return y.reshape(B, T, num_joints_out, 3)


if __name__ == "__main__":
    # small shapes consistent with the module's forward
    num_joints_in, in_features, num_joints_out = 8, 2, 8
    B, T = 2, 16
    filter_widths = [3]             # odd, as asserted by the module
    _pad = [filter_widths[0] // 2]  # receptive-field bookkeeping (unused here)

    key = jax.random.PRNGKey(0)
    kx, kp = jax.random.split(key)
    x = jax.random.normal(kx, (B, T, num_joints_in, in_features), jnp.float32)
    params = make_params(kp, num_joints_in, in_features, num_joints_out)
    prepared = prepare_params(params)   # hoisted out of the forward path

    out = temporal_model_base_forward(x, prepared, num_joints_in, in_features,
                                      num_joints_out)
    out = jax.block_until_ready(out)

    ref = _reference(x, params, num_joints_in, in_features, num_joints_out)
    assert out.shape == (B, T, num_joints_out, 3), out.shape
    # f32 MXU path -> tight tolerance vs the f32 reference.
    assert jnp.allclose(out, ref, atol=1e-4, rtol=1e-4), "mismatch vs reference"
    print("KERNEL_OK")
</pallas_src>

<mosaic_0001>
module attributes {stable_mosaic.version = 11 : i64} {
  func.func @_fused_bn_relu_shrink_kernel(%arg0: i32, %arg1: memref<32x16xf32, #tpu.memory_space<vmem>>, %arg2: memref<2x16xf32, #tpu.memory_space<vmem>>, %arg3: memref<16x24xf32, #tpu.memory_space<vmem>>, %arg4: memref<1x24xf32, #tpu.memory_space<vmem>>, %arg5: memref<32x24xf32, #tpu.memory_space<vmem>>) attributes {dimension_semantics = [#tpu.dimension_semantics<parallel>], iteration_bounds = array<i64: 1>, scalar_prefetch = 0 : i64, scratch_operands = 0 : i64, tpu.core_type = #tpu.core_type<tc>, window_params = [{transform_indices = @transform_0, window_bounds = array<i64: 32, 16>}, {pipeline_mode = #tpu.pipeline_mode<synchronous>, transform_indices = @transform_1, window_bounds = array<i64: 2, 16>}, {pipeline_mode = #tpu.pipeline_mode<synchronous>, transform_indices = @transform_2, window_bounds = array<i64: 16, 24>}, {pipeline_mode = #tpu.pipeline_mode<synchronous>, transform_indices = @transform_3, window_bounds = array<i64: 1, 24>}, {transform_indices = @transform_4, window_bounds = array<i64: 32, 24>}]} {
    %c0 = arith.constant 0 : index
    %c0_0 = arith.constant 0 : index
    %0 = vector.load %arg1[%c0, %c0_0] : memref<32x16xf32, #tpu.memory_space<vmem>>, vector<32x16xf32>
    %c0_1 = arith.constant 0 : index
    %c0_2 = arith.constant 0 : index
    %1 = vector.load %arg2[%c0_1, %c0_2] : memref<2x16xf32, #tpu.memory_space<vmem>>, vector<1x16xf32>
    %c1 = arith.constant 1 : index
    %c0_3 = arith.constant 0 : index
    %2 = vector.load %arg2[%c1, %c0_3] : memref<2x16xf32, #tpu.memory_space<vmem>>, vector<1x16xf32>
    %3 = vector.broadcast %1 : vector<1x16xf32> to vector<32x16xf32>
    %4 = arith.mulf %0, %3 : vector<32x16xf32>
    %5 = vector.broadcast %2 : vector<1x16xf32> to vector<32x16xf32>
    %6 = arith.addf %4, %5 : vector<32x16xf32>
    %cst = arith.constant 0.000000e+00 : f32
    %7 = vector.broadcast %cst : f32 to vector<32x16xf32>
    %8 = arith.maximumf %6, %7 : vector<32x16xf32>
    %c0_4 = arith.constant 0 : index
    %c0_5 = arith.constant 0 : index
    %9 = vector.load %arg3[%c0_4, %c0_5] : memref<16x24xf32, #tpu.memory_space<vmem>>, vector<16x24xf32>
    %cst_6 = arith.constant dense<0.000000e+00> : vector<32x24xf32>
    %10 = tpu.matmul %8, %9, %cst_6 {dimension_numbers = #tpu.dot_dimension_numbers<[1], [0], [0], [1], [0, 0, 1, 1], [], []>} : vector<32x16xf32>, vector<16x24xf32>, vector<32x24xf32> -> vector<32x24xf32>
    %c0_7 = arith.constant 0 : index
    %c0_8 = arith.constant 0 : index
    %11 = vector.load %arg4[%c0_7, %c0_8] : memref<1x24xf32, #tpu.memory_space<vmem>>, vector<1x24xf32>
    %12 = vector.broadcast %11 : vector<1x24xf32> to vector<32x24xf32>
    %13 = arith.addf %10, %12 : vector<32x24xf32>
    %c0_9 = arith.constant 0 : index
    %c0_10 = arith.constant 0 : index
    %14 = vector.load %arg5[%c0_9, %c0_10] : memref<32x24xf32, #tpu.memory_space<vmem>>, vector<32x24xf32>
    tpu.vector_store %arg5[%c0_9, %c0_10], %13 {strides = array<i32>} : memref<32x24xf32, #tpu.memory_space<vmem>>, vector<32x24xf32>,
    return
  }
  func.func @transform_0(%arg0: i32) -> (i32, i32) {
    %c0_i32 = arith.constant 0 : i32
    %c0_i32_0 = arith.constant 0 : i32
    return %arg0, %c0_i32 : i32, i32
  }
  func.func @transform_1(%arg0: i32) -> (i32, i32) {
    %c0_i32 = arith.constant 0 : i32
    %c0_i32_0 = arith.constant 0 : i32
    %c0_i32_1 = arith.constant 0 : i32
    return %c0_i32, %c0_i32_0 : i32, i32
  }
  func.func @transform_2(%arg0: i32) -> (i32, i32) {
    %c0_i32 = arith.constant 0 : i32
    %c0_i32_0 = arith.constant 0 : i32
    %c0_i32_1 = arith.constant 0 : i32
    return %c0_i32, %c0_i32_0 : i32, i32
  }
  func.func @transform_3(%arg0: i32) -> (i32, i32) {
    %c0_i32 = arith.constant 0 : i32
    %c0_i32_0 = arith.constant 0 : i32
    %c0_i32_1 = arith.constant 0 : i32
    return %c0_i32, %c0_i32_0 : i32, i32
  }
  func.func @transform_4(%arg0: i32) -> (i32, i32) {
    %c0_i32 = arith.constant 0 : i32
    %c0_i32_0 = arith.constant 0 : i32
    return %arg0, %c0_i32 : i32, i32
  }
}

</mosaic_0001>

<bundles_post_ra>
// kernel: tpu_custom_call.1
= control target key start
LH: loop header
LB: loop body
LE: loop exit
PB: predicated region body
PF: predicated region fallthrough
CT: control target
= control target key end

     0   :  { %vm52_vm0 = vcmask 130048   ;;  %vm150_vm1 = vcmask 195584   ;;  %s252_s2 = inlined_call_operand.vmem [shape: f32[16,24], index: 2, kind: input, shape index: {}]   ;;  %s253_s0 = inlined_call_operand.vmem [shape: f32[32,16], index: 0, kind: input, shape index: {}]   ;;  %s254_s1 = inlined_call_operand.vmem [shape: f32[2,16], index: 1, kind: input, shape index: {}]   ;;  %s255_s3 = inlined_call_operand.vmem [shape: f32[1,24], index: 3, kind: input, shape index: {}]   ;;  %s256_s4 = inlined_call_operand.vmem [shape: f32[32,24], index: 4, kind: output, shape index: {}]  }
   0x1   :  { %v43_v0 = vld [vmem:[%s252_s2] sm:$0xff]  ;;  %v44_v1 = vld [vmem:[%s252_s2 + $0x8] sm:$0xff]  ;;  %v19_v6 = vld [vmem:[%s253_s0 + $0x10] sm:$0xff] }
   0x2   :  { %v17_v2 = vld [vmem:[%s253_s0] sm:$0xff]  ;;  %v182_v3 = vpack.c.bf16 %v44_v1, %v43_v0  ;;  %v18_v9 = vld [vmem:[%s253_s0 + $0x8] sm:$0xff]  ;;  %v20_v10 = vld [vmem:[%s253_s0 + $0x18] sm:$0xff] }
   0x3   :  { %v159_v4 = vld [vmem:[%s254_s1] ss:$0 sm:$0xff]  ;;  %v160_v5 = vld [vmem:[%s254_s1 + $0x1] ss:$0 sm:$0xff] }
   0x4   :  { %v27_v7 = vmul.f32 %v159_v4, %v17_v2  ;;  %v29_v8 = vmul.f32 %v159_v4, %v19_v6  ;;  %183 = vmatprep.subr.bf16.mxu0 %v182_v3  ;;  %186 = vmatprep.subr.bf16.mxu1 %v182_v3  ;;  %v28_v11 = vmul.f32 %v159_v4, %v18_v9  ;;  %v161_v21 = vld [vmem:[%s255_s3] ss:$0 sm:$0xff] }
   0x5   :  { %v30_v12 = vmul.f32 %v159_v4, %v20_v10  ;;  %185 = vmatpush3.bf16.msra.mxu0 %v182_v3  ;;  %187 = vmatpush3.bf16.msra.mxu1 %v182_v3 }
   0x6   :  { %v35_v13 = vadd.f32 %v160_v5, %v27_v7  ;;  %v37_v14 = vadd.f32 %v160_v5, %v29_v8  ;;  %v36_v15 = vadd.f32 %v160_v5, %v28_v11 }
   0x7   :  { %v38_v16 = vadd.f32 %v160_v5, %v30_v12 }
   0x8   :  { %v39_v17 = vmax.f32 %v35_v13, 0.0  ;;  %v41_v18 = vmax.f32 %v37_v14, 0.0  ;;  %v40_v19 = vmax.f32 %v36_v15, 0.0 }
   0x9   :  { %v42_v20 = vmax.f32 %v38_v16, 0.0 }
   0xa   :  { %176 = vmatprep.mubr.msk.f32.mxu0 %vm52_vm0, %v39_v17  ;;  %179 = vmatprep.mubr.msk.f32.mxu1 %vm52_vm0, %v41_v18 }
   0xb   :  { %177 = vmatmul.mubr.msk.f32.vlgmr.msra.gmra.mrb[0].mxu0 %vm52_vm0, %v40_v19  ;;  %180 = vmatmul.mubr.msk.f32.vlgmr.msra.gmra.mrb[0].mxu1 %vm52_vm0, %v42_v20 }
  0xde   :  { %v178_v22 = vpop.f32.mrb[0].mxu0  ;;  %v181_v23 = vpop.f32.mrb[0].mxu1 }
  0xdf   :  { %v137_v24 = vadd.f32 %v178_v22, %v161_v21  ;;  %v147_v25 = vadd.f32 %v181_v23, %v161_v21  ;;  %v131_v26 = vpop.f32.mrb[1].mxu0  ;;  %v141_v27 = vpop.f32.mrb[1].mxu1 }
  0xe0   :  { %v132_v28 = vadd.f32 %v161_v21, %v131_v26  ;;  %v142_v29 = vadd.f32 %v161_v21, %v141_v27 }
  0xe1   :  { %152 = vst.msk [vmem:[%s256_s4 + $0x8] sm:$0xff] %vm150_vm1, %v137_v24  ;;  %154 = vst.msk [vmem:[%s256_s4 + $0x18] sm:$0xff] %vm150_vm1, %v147_v25 }
  0xe2   :  { %151 = vst.msk [vmem:[%s256_s4] sm:$0xff] %vm150_vm1, %v132_v28  ;;  %153 = vst.msk [vmem:[%s256_s4 + $0x10] sm:$0xff] %vm150_vm1, %v142_v29 }

</bundles_post_ra>
